<compile_context>
chip_gen: v6e
topology: v6e:2x2x1
jax: 0.10.0
libtpu: 0.0.40
codegen_flags: <defaults>
</compile_context>

<pallas_src>
import functools

import jax
import jax.numpy as jnp
from jax.experimental import pallas as pl
from jax.experimental.pallas import tpu as pltpu


def _round_up(x: int, m: int) -> int:
    return ((x + m - 1) // m) * m


def _cdiv(a: int, b: int) -> int:
    return -(-a // b)


def mlp_kernel(x_ref, w1_ref, b1_ref, w2_ref, b2_ref, w3_ref, b3_ref, o_ref):
    # x arrives as f32 (HBM stream read once); cast to bf16 on the VPU here so
    # no separate wrapper-side conversion pass over x is needed.
    x = x_ref[...].astype(jnp.bfloat16)

    # Layer 1: (TB, 784) @ (784, 128); bf16 operands, f32 accumulate on MXU.
    h1 = jnp.dot(x, w1_ref[...], preferred_element_type=jnp.float32)
    h1 = jnp.maximum(h1 + b1_ref[...], 0.0)          # bias + ReLU in f32 (VPU)
    # Dropout(0.2) -> identity in eval mode.

    # Layer 2: (TB, 128) @ (128, 128)  (cols 64..127 of w2/b2 are zero padding).
    h2 = jnp.dot(h1.astype(w2_ref.dtype), w2_ref[...],
                 preferred_element_type=jnp.float32)
    h2 = jnp.maximum(h2 + b2_ref[...], 0.0)
    # Dropout(0.2) -> identity in eval mode.

    # Layer 3: (TB, 128) @ (128, 128)  (rows 64.. / cols 10.. are zero padding).
    logits = jnp.dot(h2.astype(w3_ref.dtype), w3_ref[...],
                     preferred_element_type=jnp.float32) + b3_ref[...]

    # bf16 output halves the output HBM stream; lanes 10..127 are zero.
    o_ref[...] = logits.astype(o_ref.dtype)


def _prep_params(params, compute_dtype):
    """Pad middle/output layers to lane-dense (128) widths; cast MXU operands."""
    w1, b1, w2, b2, w3, b3 = params
    w2p = jnp.zeros((128, 128), jnp.float32).at[:, :64].set(w2)
    b2p = jnp.zeros((1, 128), jnp.float32).at[:, :64].set(b2)
    w3p = jnp.zeros((128, 128), jnp.float32).at[:64, :10].set(w3)
    b3p = jnp.zeros((1, 128), jnp.float32).at[:, :10].set(b3)
    return (
        w1.astype(compute_dtype), b1.astype(jnp.float32),
        w2p.astype(compute_dtype), b2p,
        w3p.astype(compute_dtype), b3p,
    )


@functools.partial(jax.jit, static_argnames=("block_b",))
def standard_mlp_forward(x, params, *, block_b: int = 2048):
    """x: (B, 1, 28, 28) float32 NCHW. Returns logits (B, 10) float32."""
    compute_dtype = jnp.bfloat16
    w1, b1, w2p, b2p, w3p, b3p = _prep_params(params, compute_dtype)

    B = x.shape[0]
    # nn.Flatten; keep f32 — the bf16 cast happens inside the kernel.
    x_flat = x.reshape(B, 784)

    # Adaptive batch tile: split B into the fewest tiles <= block_b, rounded up
    # to a multiple of 16 (bf16 sublane packing for the output block). Worst
    # case padding is ~15 rows per grid step instead of up to tb-1.
    n_steps = max(1, _cdiv(B, block_b))
    tb = _round_up(_cdiv(B, n_steps), 16)
    b_padded = _round_up(B, tb)
    if b_padded != B:
        x_flat = jnp.pad(x_flat, ((0, b_padded - B), (0, 0)))

    out = pl.pallas_call(
        mlp_kernel,
        out_shape=jax.ShapeDtypeStruct((b_padded, 128), jnp.bfloat16),
        grid_spec=pl.GridSpec(
            grid=(b_padded // tb,),
            in_specs=[
                pl.BlockSpec((tb, 784), lambda i: (i, 0)),     # x: batch-tiled f32
                pl.BlockSpec((784, 128), lambda i: (0, 0)),    # weights: VMEM-resident
                pl.BlockSpec((1, 128), lambda i: (0, 0)),
                pl.BlockSpec((128, 128), lambda i: (0, 0)),
                pl.BlockSpec((1, 128), lambda i: (0, 0)),
                pl.BlockSpec((128, 128), lambda i: (0, 0)),
                pl.BlockSpec((1, 128), lambda i: (0, 0)),
            ],
            out_specs=pl.BlockSpec((tb, 128), lambda i: (i, 0)),
        ),
        compiler_params=pltpu.CompilerParams(
            dimension_semantics=("parallel",),        # megacore sharding (v7x)
            # Explicit: v5e's scoped default is 16 MiB. Actual use at tb=2048
            # is ~16 MiB (2 x 6.3 MiB f32 x + 1 MiB bf16 out + <1 MiB weights),
            # well under v7x's 64 MiB/TC physical.
            vmem_limit_bytes=64 * 1024 * 1024,
        ),
    )(x_flat, w1, b1, w2p, b2p, w3p, b3p)

    return out[:B, :10].astype(jnp.float32)


def init_params(key):
    """Deterministic init matching nn.Linear shapes (stored transposed: (in, out))."""
    k1, k2, k3, k4, k5, k6 = jax.random.split(key, 6)

    def linear_init(kw, kb, fan_in, fan_out):
        bound = 1.0 / jnp.sqrt(fan_in)
        w = jax.random.uniform(kw, (fan_in, fan_out), jnp.float32, -bound, bound)
        b = jax.random.uniform(kb, (1, fan_out), jnp.float32, -bound, bound)
        return w, b

    w1, b1 = linear_init(k1, k2, 784, 128)
    w2, b2 = linear_init(k3, k4, 128, 64)
    w3, b3 = linear_init(k5, k6, 64, 10)
    return (w1, b1, w2, b2, w3, b3)


def reference_forward(x, params, *, mixed=True):
    """Pure-JAX reference (eval-mode forward).

    mixed=True replicates the kernel's precision scheme (bf16 MXU operands,
    f32 accumulation, bf16 output rounding); mixed=False is the full-f32
    PyTorch-equivalent math.
    """
    w1, b1, w2, b2, w3, b3 = params
    h = x.reshape(x.shape[0], 784)
    if mixed:
        cd = jnp.bfloat16
        h1 = jnp.dot(h.astype(cd), w1.astype(cd), preferred_element_type=jnp.float32)
        h1 = jnp.maximum(h1 + b1, 0.0)
        h2 = jnp.dot(h1.astype(cd), w2.astype(cd), preferred_element_type=jnp.float32)
        h2 = jnp.maximum(h2 + b2, 0.0)
        logits = jnp.dot(h2.astype(cd), w3.astype(cd),
                         preferred_element_type=jnp.float32) + b3
        return logits.astype(cd).astype(jnp.float32)   # kernel stores bf16 output
    h1 = jnp.maximum(h @ w1 + b1, 0.0)
    h2 = jnp.maximum(h1 @ w2 + b2, 0.0)
    return h2 @ w3 + b3


if __name__ == "__main__":
    key = jax.random.PRNGKey(0)
    kx, kp = jax.random.split(key)

    B = 8
    x = jax.random.normal(kx, (B, 1, 28, 28), dtype=jnp.float32)  # NCHW MNIST-like
    params = init_params(kp)

    out = standard_mlp_forward(x, params)
    out = jax.block_until_ready(out)
    assert out.shape == (B, 10), out.shape

    # Strict check vs a reference using the same bf16-operand / f32-accumulate
    # / bf16-output scheme.
    ref_mixed = reference_forward(x, params, mixed=True)
    assert jnp.allclose(out, ref_mixed, atol=2e-2, rtol=2e-2), "mismatch vs mixed-precision reference"

    # Loose sanity check vs the full-f32 PyTorch-equivalent math.
    ref_f32 = reference_forward(x, params, mixed=False)
    assert jnp.allclose(out, ref_f32, atol=0.15, rtol=0.1), "mismatch vs f32 reference"

    print("KERNEL_OK")
</pallas_src>

<mosaic_0001>
module attributes {stable_mosaic.version = 11 : i64} {
  func.func @mlp_kernel(%arg0: i32, %arg1: memref<16x784xf32, #tpu.memory_space<vmem>>, %arg2: memref<784x128xbf16, #tpu.memory_space<vmem>>, %arg3: memref<1x128xf32, #tpu.memory_space<vmem>>, %arg4: memref<128x128xbf16, #tpu.memory_space<vmem>>, %arg5: memref<1x128xf32, #tpu.memory_space<vmem>>, %arg6: memref<128x128xbf16, #tpu.memory_space<vmem>>, %arg7: memref<1x128xf32, #tpu.memory_space<vmem>>, %arg8: memref<16x128xbf16, #tpu.memory_space<vmem>>) attributes {dimension_semantics = [#tpu.dimension_semantics<parallel>], iteration_bounds = array<i64: 1>, scalar_prefetch = 0 : i64, scratch_operands = 0 : i64, tpu.core_type = #tpu.core_type<tc>, window_params = [{transform_indices = @transform_0, window_bounds = array<i64: 16, 784>}, {pipeline_mode = #tpu.pipeline_mode<synchronous>, transform_indices = @transform_1, window_bounds = array<i64: 784, 128>}, {pipeline_mode = #tpu.pipeline_mode<synchronous>, transform_indices = @transform_2, window_bounds = array<i64: 1, 128>}, {pipeline_mode = #tpu.pipeline_mode<synchronous>, transform_indices = @transform_3, window_bounds = array<i64: 128, 128>}, {pipeline_mode = #tpu.pipeline_mode<synchronous>, transform_indices = @transform_4, window_bounds = array<i64: 1, 128>}, {pipeline_mode = #tpu.pipeline_mode<synchronous>, transform_indices = @transform_5, window_bounds = array<i64: 128, 128>}, {pipeline_mode = #tpu.pipeline_mode<synchronous>, transform_indices = @transform_6, window_bounds = array<i64: 1, 128>}, {transform_indices = @transform_7, window_bounds = array<i64: 16, 128>}]} {
    %c0 = arith.constant 0 : index
    %c0_0 = arith.constant 0 : index
    %0 = vector.load %arg1[%c0, %c0_0] : memref<16x784xf32, #tpu.memory_space<vmem>>, vector<16x784xf32>
    %1 = arith.truncf %0 : vector<16x784xf32> to vector<16x784xbf16>
    %c0_1 = arith.constant 0 : index
    %c0_2 = arith.constant 0 : index
    %2 = vector.load %arg2[%c0_1, %c0_2] : memref<784x128xbf16, #tpu.memory_space<vmem>>, vector<784x128xbf16>
    %cst = arith.constant dense<0.000000e+00> : vector<16x128xf32>
    %3 = tpu.matmul %1, %2, %cst {dimension_numbers = #tpu.dot_dimension_numbers<[1], [0], [0], [1], [0, 0, 1, 1], [], []>} : vector<16x784xbf16>, vector<784x128xbf16>, vector<16x128xf32> -> vector<16x128xf32>
    %c0_3 = arith.constant 0 : index
    %c0_4 = arith.constant 0 : index
    %4 = vector.load %arg3[%c0_3, %c0_4] : memref<1x128xf32, #tpu.memory_space<vmem>>, vector<1x128xf32>
    %5 = vector.broadcast %4 : vector<1x128xf32> to vector<16x128xf32>
    %6 = arith.addf %3, %5 : vector<16x128xf32>
    %cst_5 = arith.constant 0.000000e+00 : f32
    %7 = vector.broadcast %cst_5 : f32 to vector<16x128xf32>
    %8 = arith.maximumf %6, %7 : vector<16x128xf32>
    %9 = arith.truncf %8 : vector<16x128xf32> to vector<16x128xbf16>
    %c0_6 = arith.constant 0 : index
    %c0_7 = arith.constant 0 : index
    %10 = vector.load %arg4[%c0_6, %c0_7] : memref<128x128xbf16, #tpu.memory_space<vmem>>, vector<128x128xbf16>
    %cst_8 = arith.constant dense<0.000000e+00> : vector<16x128xf32>
    %11 = tpu.matmul %9, %10, %cst_8 {dimension_numbers = #tpu.dot_dimension_numbers<[1], [0], [0], [1], [0, 0, 1, 1], [], []>} : vector<16x128xbf16>, vector<128x128xbf16>, vector<16x128xf32> -> vector<16x128xf32>
    %c0_9 = arith.constant 0 : index
    %c0_10 = arith.constant 0 : index
    %12 = vector.load %arg5[%c0_9, %c0_10] : memref<1x128xf32, #tpu.memory_space<vmem>>, vector<1x128xf32>
    %13 = vector.broadcast %12 : vector<1x128xf32> to vector<16x128xf32>
    %14 = arith.addf %11, %13 : vector<16x128xf32>
    %cst_11 = arith.constant 0.000000e+00 : f32
    %15 = vector.broadcast %cst_11 : f32 to vector<16x128xf32>
    %16 = arith.maximumf %14, %15 : vector<16x128xf32>
    %17 = arith.truncf %16 : vector<16x128xf32> to vector<16x128xbf16>
    %c0_12 = arith.constant 0 : index
    %c0_13 = arith.constant 0 : index
    %18 = vector.load %arg6[%c0_12, %c0_13] : memref<128x128xbf16, #tpu.memory_space<vmem>>, vector<128x128xbf16>
    %cst_14 = arith.constant dense<0.000000e+00> : vector<16x128xf32>
    %19 = tpu.matmul %17, %18, %cst_14 {dimension_numbers = #tpu.dot_dimension_numbers<[1], [0], [0], [1], [0, 0, 1, 1], [], []>} : vector<16x128xbf16>, vector<128x128xbf16>, vector<16x128xf32> -> vector<16x128xf32>
    %c0_15 = arith.constant 0 : index
    %c0_16 = arith.constant 0 : index
    %20 = vector.load %arg7[%c0_15, %c0_16] : memref<1x128xf32, #tpu.memory_space<vmem>>, vector<1x128xf32>
    %21 = vector.broadcast %20 : vector<1x128xf32> to vector<16x128xf32>
    %22 = arith.addf %19, %21 : vector<16x128xf32>
    %23 = arith.truncf %22 : vector<16x128xf32> to vector<16x128xbf16>
    %c0_17 = arith.constant 0 : index
    %c0_18 = arith.constant 0 : index
    %24 = vector.load %arg8[%c0_17, %c0_18] : memref<16x128xbf16, #tpu.memory_space<vmem>>, vector<16x128xbf16>
    tpu.vector_store %arg8[%c0_17, %c0_18], %23 {strides = array<i32>} : memref<16x128xbf16, #tpu.memory_space<vmem>>, vector<16x128xbf16>,
    return
  }
  func.func @transform_0(%arg0: i32) -> (i32, i32) {
    %c0_i32 = arith.constant 0 : i32
    %c0_i32_0 = arith.constant 0 : i32
    return %arg0, %c0_i32 : i32, i32
  }
  func.func @transform_1(%arg0: i32) -> (i32, i32) {
    %c0_i32 = arith.constant 0 : i32
    %c0_i32_0 = arith.constant 0 : i32
    %c0_i32_1 = arith.constant 0 : i32
    return %c0_i32, %c0_i32_0 : i32, i32
  }
  func.func @transform_2(%arg0: i32) -> (i32, i32) {
    %c0_i32 = arith.constant 0 : i32
    %c0_i32_0 = arith.constant 0 : i32
    %c0_i32_1 = arith.constant 0 : i32
    return %c0_i32, %c0_i32_0 : i32, i32
  }
  func.func @transform_3(%arg0: i32) -> (i32, i32) {
    %c0_i32 = arith.constant 0 : i32
    %c0_i32_0 = arith.constant 0 : i32
    %c0_i32_1 = arith.constant 0 : i32
    return %c0_i32, %c0_i32_0 : i32, i32
  }
  func.func @transform_4(%arg0: i32) -> (i32, i32) {
    %c0_i32 = arith.constant 0 : i32
    %c0_i32_0 = arith.constant 0 : i32
    %c0_i32_1 = arith.constant 0 : i32
    return %c0_i32, %c0_i32_0 : i32, i32
  }
  func.func @transform_5(%arg0: i32) -> (i32, i32) {
    %c0_i32 = arith.constant 0 : i32
    %c0_i32_0 = arith.constant 0 : i32
    %c0_i32_1 = arith.constant 0 : i32
    return %c0_i32, %c0_i32_0 : i32, i32
  }
  func.func @transform_6(%arg0: i32) -> (i32, i32) {
    %c0_i32 = arith.constant 0 : i32
    %c0_i32_0 = arith.constant 0 : i32
    %c0_i32_1 = arith.constant 0 : i32
    return %c0_i32, %c0_i32_0 : i32, i32
  }
  func.func @transform_7(%arg0: i32) -> (i32, i32) {
    %c0_i32 = arith.constant 0 : i32
    %c0_i32_0 = arith.constant 0 : i32
    return %arg0, %c0_i32 : i32, i32
  }
}

</mosaic_0001>

<bundles_post_ra>
// kernel: standard_mlp_forward.1
= control target key start
LH: loop header
LB: loop body
LE: loop exit
PB: predicated region body
PF: predicated region fallthrough
CT: control target
= control target key end

     0   :  { %v1136_v43 = vmov 0.0   ;;  %vm1137_vm0 = vmmov 0   ;;  %vm447_vm1 = vcmask 130048   ;;  %s1450_s1 = inlined_call_operand.vmem [shape: bf16[784,128], index: 1, kind: input, shape index: {}]   ;;  %s1451_s0 = inlined_call_operand.vmem [shape: f32[16,784], index: 0, kind: input, shape index: {}]   ;;  %s1452_s3 = inlined_call_operand.vmem [shape: bf16[128,128], index: 3, kind: input, shape index: {}]   ;;  %s1453_s5 = inlined_call_operand.vmem [shape: bf16[128,128], index: 5, kind: input, shape index: {}]   ;;  %s1454_s2 = inlined_call_operand.vmem [shape: f32[1,128], index: 2, kind: input, shape index: {}]   ;;  %s1455_s4 = inlined_call_operand.vmem [shape: f32[1,128], index: 4, kind: input, shape index: {}]   ;;  %s1456_s6 = inlined_call_operand.vmem [shape: f32[1,128], index: 6, kind: input, shape index: {}]   ;;  %s1457_s7 = inlined_call_operand.vmem [shape: bf16[16,128], index: 7, kind: output, shape index: {}]  }
   0x1   :  { %v1071_v0 = vld [vmem:[%s1450_s1 + $0x78] sm:$0xff]   ;;  %v1075_v4 = vld [vmem:[%s1450_s1 + $0x70] sm:$0xff]   ;;  %v1079_v8 = vld [vmem:[%s1450_s1 + $0x68] sm:$0xff]  }
   0x2   :  { %v1072_v1 = vld [vmem:[%s1450_s1 + $0x38] sm:$0xff]   ;;  %937 = vmatprep.subr.bf16.mxu0 %v1071_v0  ;;  %v1076_v5 = vld [vmem:[%s1450_s1 + $0x30] sm:$0xff]   ;;  %v1080_v9 = vld [vmem:[%s1450_s1 + $0x28] sm:$0xff]  }
   0x3   :  { %v1073_v2 = vld [vmem:[%s1450_s1 + $0xf8] sm:$0xff]   ;;  %938 = vmatpush3.bf16.msra.mxu0 %v1072_v1  ;;  %v1077_v6 = vld [vmem:[%s1450_s1 + $0xf0] sm:$0xff]   ;;  %v1081_v10 = vld [vmem:[%s1450_s1 + $0xe8] sm:$0xff]  }
   0x4   :  { %v1074_v3 = vld [vmem:[%s1450_s1 + $0xb8] sm:$0xff]   ;;  %959 = vmatprep.subr.bf16.mxu1 %v1073_v2  ;;  %939 = vmatprep.subr.bf16.mxu0 %v1075_v4  ;;  %v1078_v7 = vld [vmem:[%s1450_s1 + $0xb0] sm:$0xff]   ;;  %v1082_v11 = vld [vmem:[%s1450_s1 + $0xa8] sm:$0xff]  }
   0x5   :  { %960 = vmatpush3.bf16.msra.mxu1 %v1074_v3  ;;  %v1083_v12 = vld [vmem:[%s1450_s1 + $0x60] sm:$0xff]   ;;  %v1087_v16 = vld [vmem:[%s1450_s1 + $0x58] sm:$0xff]   ;;  %v1091_v20 = vld [vmem:[%s1450_s1 + $0x50] sm:$0xff]  }
   0x6   :  { %961 = vmatprep.subr.bf16.mxu1 %v1077_v6  ;;  %v1084_v13 = vld [vmem:[%s1450_s1 + $0x20] sm:$0xff]   ;;  %v1088_v17 = vld [vmem:[%s1450_s1 + $0x18] sm:$0xff]   ;;  %v1092_v21 = vld [vmem:[%s1450_s1 + $0x10] sm:$0xff]  }
   0x7   :  { %940 = vmatpush3.bf16.msra.mxu0 %v1076_v5  ;;  %v1085_v14 = vld [vmem:[%s1450_s1 + $0xe0] sm:$0xff]   ;;  %v1089_v18 = vld [vmem:[%s1450_s1 + $0xd8] sm:$0xff]   ;;  %v1093_v22 = vld [vmem:[%s1450_s1 + $0xd0] sm:$0xff]  }
   0x8   :  { %941 = vmatprep.subr.bf16.mxu0 %v1079_v8  ;;  %v1086_v15 = vld [vmem:[%s1450_s1 + $0xa0] sm:$0xff]   ;;  %v1090_v19 = vld [vmem:[%s1450_s1 + $0x98] sm:$0xff]   ;;  %v1094_v23 = vld [vmem:[%s1450_s1 + $0x90] sm:$0xff]  }
   0x9   :  { %962 = vmatpush3.bf16.msra.mxu1 %v1078_v7  ;;  %v1095_v24 = vld [vmem:[%s1450_s1 + $0x48] sm:$0xff]   ;;  %v1099_v28 = vld [vmem:[%s1450_s1 + $0x40] sm:$0xff]   ;;  %v34_v36 = vld [vmem:[%s1451_s0 + $0x38] sm:$0xff] }
   0xa   :  { %963 = vmatprep.subr.bf16.mxu1 %v1081_v10  ;;  %v1096_v25 = vld [vmem:[%s1450_s1 + $0x8] sm:$0xff]   ;;  %v1100_v29 = vld [vmem:[%s1450_s1] sm:$0xff]   ;;  %v1103_v38 = vld [vmem:[%s1450_s1 + $0x178] sm:$0xff]  }
   0xb   :  { %942 = vmatpush3.bf16.msra.mxu0 %v1080_v9  ;;  %v1097_v26 = vld [vmem:[%s1450_s1 + $0xc8] sm:$0xff]   ;;  %v1101_v30 = vld [vmem:[%s1450_s1 + $0xc0] sm:$0xff]   ;;  %v30_v39 = vld [vmem:[%s1451_s0 + $0x18] sm:$0xff] }
   0xc   :  { %943 = vmatprep.subr.bf16.mxu0 %v1083_v12  ;;  %v1098_v27 = vld [vmem:[%s1450_s1 + $0x88] sm:$0xff]   ;;  %v35_v32 = vld [vmem:[%s1451_s0 + $0x40] sm:$0xff]  ;;  %v37_v40 = vld [vmem:[%s1451_s0 + $0x50] sm:$0xff] }
   0xd   :  { %964 = vmatpush3.bf16.msra.mxu1 %v1082_v11  ;;  %v28_v31 = vld [vmem:[%s1451_s0 + $0x8] sm:$0xff]  ;;  %v1102_v34 = vld [vmem:[%s1450_s1 + $0x80] sm:$0xff]   ;;  %v44_v41 = vpack.c.bf16 %v37_v40, %v30_v39  ;;  %v1104_v42 = vld [vmem:[%s1450_s1 + $0x138] sm:$0xff]  }
   0xe   :  { %965 = vmatprep.subr.bf16.mxu1 %v1085_v14  ;;  %v42_v33 = vpack.c.bf16 %v35_v32, %v28_v31  ;;  %v27_v35 = vld [vmem:[%s1451_s0] sm:$0xff]  ;;  %v29_v44 = vld [vmem:[%s1451_s0 + $0x10] sm:$0xff]  ;;  %v36_v45 = vld [vmem:[%s1451_s0 + $0x48] sm:$0xff] }
   0xf   :  { %944 = vmatpush3.bf16.msra.mxu0 %v1084_v13  ;;  %v41_v37 = vpack.c.bf16 %v34_v36, %v27_v35  ;;  %524 = vmatprep.mubr.bf16.mxu1 %v44_v41  ;;  %v43_v46 = vpack.c.bf16 %v36_v45, %v29_v44  ;;  %v1105_v47 = vld [vmem:[%s1450_s1 + $0x170] sm:$0xff]   ;;  %v1107_v49 = vld [vmem:[%s1450_s1 + $0x168] sm:$0xff]   ;;  %v1109_v51 = vld [vmem:[%s1450_s1 + $0x160] sm:$0xff]  }
  0x10   :  { %945 = vmatprep.subr.bf16.mxu0 %v1087_v16  ;;  %483 = vmatprep.mubr.bf16.mxu0 %v42_v33  ;;  %v1106_v48 = vld [vmem:[%s1450_s1 + $0x130] sm:$0xff]   ;;  %v1108_v50 = vld [vmem:[%s1450_s1 + $0x128] sm:$0xff]   ;;  %v1110_v52 = vld [vmem:[%s1450_s1 + $0x120] sm:$0xff]  }
  0x11   :  { %966 = vmatpush3.bf16.msra.mxu1 %v1086_v15  ;;  %v1111_v53 = vld [vmem:[%s1450_s1 + $0x158] sm:$0xff]   ;;  %v1113_v55 = vld [vmem:[%s1450_s1 + $0x150] sm:$0xff]   ;;  %v1119_v56 = vld [vmem:[%s1450_s1 + $0x180] sm:$0xff]  }
  0x12   :  { %967 = vmatprep.subr.bf16.mxu1 %v1089_v18  ;;  %v1112_v54 = vld [vmem:[%s1450_s1 + $0x118] sm:$0xff]   ;;  %v32_v57 = vld [vmem:[%s1451_s0 + $0x28] sm:$0xff]  ;;  %v39_v58 = vld [vmem:[%s1451_s0 + $0x60] sm:$0xff] }
  0x13   :  { %946 = vmatpush3.bf16.msra.mxu0 %v1088_v17  ;;  %v1114_v59 = vld [vmem:[%s1450_s1 + $0x110] sm:$0xff]   ;;  %v46_v60 = vpack.c.bf16 %v39_v58, %v32_v57  ;;  %v40_v62 = vld [vmem:[%s1451_s0 + $0x68] sm:$0xff]  ;;  %v1117_v2 = vld [vmem:[%s1450_s1 + $0x140] sm:$0xff]  }
  0x14   :  { %947 = vmatprep.subr.bf16.mxu0 %v1091_v20  ;;  %v33_v61 = vld [vmem:[%s1451_s0 + $0x30] sm:$0xff]  ;;  %v1115_v63 = vld [vmem:[%s1450_s1 + $0x148] sm:$0xff]   ;;  %v1118_v3 = vld [vmem:[%s1450_s1 + $0x100] sm:$0xff]  }
  0x15   :  { %968 = vmatpush3.bf16.msra.mxu1 %v1090_v19  ;;  %v47_v0 = vpack.c.bf16 %v40_v62, %v33_v61  ;;  %v1116_v1 = vld [vmem:[%s1450_s1 + $0x108] sm:$0xff]   ;;  %v31_v4 = vld [vmem:[%s1451_s0 + $0x20] sm:$0xff]  ;;  %v38_v5 = vld [vmem:[%s1451_s0 + $0x58] sm:$0xff] }
  0x16   :  { %969 = vmatprep.subr.bf16.mxu1 %v1093_v22  ;;  %v45_v6 = vpack.c.bf16 %v38_v5, %v31_v4  ;;  %v1120_v7 = vld [vmem:[%s1452_s3 + $0x38] sm:$0xff]   ;;  %v1121_v8 = vld [vmem:[%s1452_s3 + $0x30] sm:$0xff]   ;;  %v1122_v9 = vld [vmem:[%s1452_s3 + $0x28] sm:$0xff]  }
  0x17   :  { %948 = vmatpush3.bf16.msra.mxu0 %v1092_v21  ;;  %v1123_v10 = vld [vmem:[%s1452_s3 + $0x20] sm:$0xff]   ;;  %v1124_v11 = vld [vmem:[%s1452_s3 + $0x18] sm:$0xff]   ;;  %v1125_v12 = vld [vmem:[%s1452_s3 + $0x10] sm:$0xff]  }
  0x18   :  { %949 = vmatprep.subr.bf16.mxu0 %v1095_v24  ;;  %v1126_v13 = vld [vmem:[%s1452_s3 + $0x8] sm:$0xff]   ;;  %v1127_v14 = vld [vmem:[%s1452_s3] sm:$0xff]   ;;  %v1128_v15 = vld [vmem:[%s1453_s5 + $0x38] sm:$0xff]  }
  0x19   :  { %970 = vmatpush3.bf16.msra.mxu1 %v1094_v23  ;;  %v1129_v16 = vld [vmem:[%s1453_s5 + $0x30] sm:$0xff]   ;;  %v1130_v17 = vld [vmem:[%s1453_s5 + $0x28] sm:$0xff]   ;;  %v1131_v18 = vld [vmem:[%s1453_s5 + $0x20] sm:$0xff]  }
  0x1a   :  { %971 = vmatprep.subr.bf16.mxu1 %v1097_v26  ;;  %v1132_v19 = vld [vmem:[%s1453_s5 + $0x18] sm:$0xff]   ;;  %v859_v32 = vld [vmem:[%s1454_s2] ss:$0 sm:$0xff] }
  0x1b   :  { %950 = vmatpush3.bf16.msra.mxu0 %v1096_v25  ;;  %v1135_v57 = vld [vmem:[%s1453_s5] sm:$0xff]  }
  0x1c   :  { %951 = vmatprep.subr.bf16.mxu0 %v1099_v28  ;;  %v910_v58 = vld [vmem:[%s1455_s4] ss:$0 sm:$0xff] }
  0x1d   :  { %972 = vmatpush3.bf16.msra.mxu1 %v1098_v27  ;;  %v919_v4 = vld [vmem:[%s1456_s6] ss:$0 sm:$0xff] }
  0x1e   :  { %973 = vmatprep.subr.bf16.mxu1 %v1101_v30 }
  0x1f   :  { %952 = vmatpush3.bf16.msra.mxu0 %v1100_v29 }
  0x20   :  { %981 = vmatprep.subr.bf16.mxu0 %v1103_v38 }
  0x21   :  { %974 = vmatpush3.bf16.msra.mxu1 %v1102_v34 }
  0x22   :  { %1023 = vmatprep.subr.bf16.mxu1 %v1136_v43  ;;  %484 = vmatmul.mubr.bf16.vlgmr.msra.gmra.mxu0 %v41_v37 }
  0x23   :  { %982 = vmatpush3.bf16.msra.mxu0 %v1104_v42  ;;  %565 = vmatprep.mubr.bf16.mxu0 %v46_v60 }
  0x24   :  { %525 = vmatmul.mubr.bf16.vlgmr.msra.gmra.mxu1 %v43_v46  ;;  %983 = vmatprep.subr.bf16.mxu0 %v1105_v47 }
  0x25   :  { %1025 = vmatprep.mubr.msk.bf16.mxu1 %vm1137_vm0, %v1136_v43  ;;  %1024 = vmatpush3.bf16.msra.mxu1 %v1119_v56  ;;  %v1134_v56 = vld [vmem:[%s1453_s5 + $0x8] sm:$0xff]  }
  0x26   :  { %1029 = vmatprep.subr.bf16.mxu1 %v1136_v43 }
  0x27   :  { %984 = vmatpush3.bf16.msra.mxu0 %v1106_v48 }
  0x28   :  { %985 = vmatprep.subr.bf16.mxu0 %v1107_v49 }
  0x2b   :  { %986 = vmatpush3.bf16.msra.mxu0 %v1108_v50 }
  0x2c   :  { %987 = vmatprep.subr.bf16.mxu0 %v1109_v51  ;;  %1026 = vmatmul.mubr.msk.bf16.vlgmr.msra.gmra.mxu1 %vm447_vm1, %v47_v0 }
  0x2d   :  { %1045 = vmatprep.mubr.msk.bf16.mxu1 %vm1137_vm0, %v1136_v43  ;;  %1030 = vmatpush3.bf16.msra.mxu1 %v1120_v7 }
  0x2e   :  { %1031 = vmatprep.subr.bf16.mxu1 %v1136_v43 }
  0x2f   :  { %988 = vmatpush3.bf16.msra.mxu0 %v1110_v52 }
  0x30   :  { %989 = vmatprep.subr.bf16.mxu0 %v1111_v53 }
  0x31   :  { %1032 = vmatpush3.bf16.msra.mxu1 %v1121_v8 }
  0x32   :  { %1033 = vmatprep.subr.bf16.mxu1 %v1136_v43 }
  0x33   :  { %990 = vmatpush3.bf16.msra.mxu0 %v1112_v54 }
  0x34   :  { %991 = vmatprep.subr.bf16.mxu0 %v1113_v55  ;;  %v1133_v55 = vld [vmem:[%s1453_s5 + $0x10] sm:$0xff]  }
  0x35   :  { %1034 = vmatpush3.bf16.msra.mxu1 %v1122_v9 }
  0x36   :  { %1035 = vmatprep.subr.bf16.mxu1 %v1136_v43 }
  0x37   :  { %992 = vmatpush3.bf16.msra.mxu0 %v1114_v59 }
  0x38   :  { %993 = vmatprep.subr.bf16.mxu0 %v1115_v63 }
  0x39   :  { %1036 = vmatpush3.bf16.msra.mxu1 %v1123_v10 }
  0x3a   :  { %1037 = vmatprep.subr.bf16.mxu1 %v1136_v43 }
  0x3b   :  { %994 = vmatpush3.bf16.msra.mxu0 %v1116_v1 }
  0x3c   :  { %995 = vmatprep.subr.bf16.mxu0 %v1117_v2 }
  0x3d   :  { %1038 = vmatpush3.bf16.msra.mxu1 %v1124_v11 }
  0x3e   :  { %1039 = vmatprep.subr.bf16.mxu1 %v1136_v43 }
  0x3f   :  { %996 = vmatpush3.bf16.msra.mxu0 %v1118_v3 }
  0x40   :  { %1049 = vmatprep.subr.bf16.mxu0 %v1136_v43 }
  0x41   :  { %1040 = vmatpush3.bf16.msra.mxu1 %v1125_v12 }
  0x42   :  { %566 = vmatmul.mubr.bf16.vlgmr.msra.gmra.mxu0 %v45_v6  ;;  %1041 = vmatprep.subr.bf16.mxu1 %v1136_v43 }
  0x43   :  { %1065 = vmatprep.mubr.msk.bf16.mxu0 %vm1137_vm0, %v1136_v43  ;;  %1050 = vmatpush3.bf16.msra.mxu0 %v1128_v15 }
  0x44   :  { %1051 = vmatprep.subr.bf16.mxu0 %v1136_v43 }
  0x45   :  { %1042 = vmatpush3.bf16.msra.mxu1 %v1126_v13 }
  0x46   :  { %1043 = vmatprep.subr.bf16.mxu1 %v1136_v43 }
  0x47   :  { %1052 = vmatpush3.bf16.msra.mxu0 %v1129_v16 }
  0x48   :  { %1053 = vmatprep.subr.bf16.mxu0 %v1136_v43 }
  0x49   :  { %1044 = vmatpush3.bf16.msra.mxu1 %v1127_v14 }
  0x4b   :  { %1054 = vmatpush3.bf16.msra.mxu0 %v1130_v17 }
  0x4c   :  { %1055 = vmatprep.subr.bf16.mxu0 %v1136_v43 }
  0x4f   :  { %1056 = vmatpush3.bf16.msra.mxu0 %v1131_v18 }
  0x50   :  { %1057 = vmatprep.subr.bf16.mxu0 %v1136_v43 }
  0x53   :  { %1058 = vmatpush3.bf16.msra.mxu0 %v1132_v19 }
  0x54   :  { %1059 = vmatprep.subr.bf16.mxu0 %v1136_v43 }
  0x57   :  { %1060 = vmatpush3.bf16.msra.mxu0 %v1133_v55 }
  0x58   :  { %1061 = vmatprep.subr.bf16.mxu0 %v1136_v43 }
  0x5b   :  { %1062 = vmatpush3.bf16.msra.mxu0 %v1134_v56 }
  0x5c   :  { %1063 = vmatprep.subr.bf16.mxu0 %v1136_v43 }
  0x5f   :  { %1064 = vmatpush3.bf16.msra.mxu0 %v1135_v57 }
  0xe2   :  { %v953_v23 = vpop.f32.mrf.mxu0 }
  0xe4   :  { %v975_v20 = vpop.f32.mrf.mxu1  ;;  %v954_v25 = vpop.f32.mrf.mxu0 }
  0xe5   :  { %v955_v31 = vadd.f32 %v954_v25, %v953_v23 }
  0xe6   :  { %v976_v21 = vpop.f32.mrf.mxu1  ;;  %v956_v28 = vpop.f32.mrf.mxu0 }
  0xe7   :  { %v486_v34 = vadd.f32 %v955_v31, %v859_v32  ;;  %v977_v35 = vadd.f32 %v976_v21, %v975_v20 }
  0xe8   :  { %v978_v22 = vpop.f32.mrf.mxu1  ;;  %v957_v33 = vpop.f32.mrf.mxu0 }
  0xe9   :  { %v958_v36 = vadd.f32 %v957_v33, %v956_v28  ;;  %v527_v39 = vadd.f32 %v977_v35, %v486_v34 }
  0xea   :  { %v979_v24 = vpop.f32.mrf.mxu1 }
  0xeb   :  { %v489_v40 = vadd.f32 %v958_v36, %v859_v32  ;;  %v980_v41 = vadd.f32 %v979_v24, %v978_v22 }
  0xec   :  { %v608_v26 = vpop.f32.mrf.mxu1 }
  0xed   :  { %v530_v47 = vadd.f32 %v980_v41, %v489_v40 }
  0xee   :  { %v1027_v27 = vpop.f32.mrf.mxu1 }
  0xf0   :  { %v611_v29 = vpop.f32.mrf.mxu1 }
  0xf2   :  { %v1028_v30 = vpop.f32.mrf.mxu1 }
 0x102   :  { %v997_v37 = vpop.f32.mrf.mxu0 }
 0x104   :  { %v998_v38 = vpop.f32.mrf.mxu0 }
 0x105   :  { %v999_v42 = vadd.f32 %v998_v38, %v997_v37 }
 0x106   :  { %v1000_v44 = vpop.f32.mrf.mxu0 }
 0x107   :  { %v568_v45 = vadd.f32 %v999_v42, %v527_v39 }
 0x108   :  { %v1001_v46 = vpop.f32.mrf.mxu0 }
 0x109   :  { %v1002_v48 = vadd.f32 %v1001_v46, %v1000_v44  ;;  %v609_v49 = vadd.f32 %v608_v26, %v568_v45 }
 0x10b   :  { %v571_v50 = vadd.f32 %v1002_v48, %v530_v47  ;;  %v615_v52 = vmax.f32 %v609_v49, 0.0 }
 0x10d   :  { %v612_v51 = vadd.f32 %v611_v29, %v571_v50 }
 0x10f   :  { %v616_v53 = vmax.f32 %v612_v51, 0.0 }
 0x111   :  { %v617_v54 = vpack.c.bf16 %v616_v53, %v615_v52 }
 0x113   :  { %1046 = vmatmul.mubr.bf16.vlgmr.msra.gmra.mxu1 %v617_v54 }
 0x1d3   :  { %v723_v59 = vpop.f32.mrf.mxu1 }
 0x1d4   :  { %v724_v61 = vadd.f32 %v910_v58, %v723_v59 }
 0x1d5   :  { %v1047_v60 = vpop.f32.mrf.mxu1 }
 0x1d6   :  { %v730_v1 = vmax.f32 %v724_v61, 0.0 }
 0x1d7   :  { %v726_v62 = vpop.f32.mrf.mxu1 }
 0x1d8   :  { %v727_v63 = vadd.f32 %v910_v58, %v726_v62 }
 0x1d9   :  { %v1048_v0 = vpop.f32.mrf.mxu1 }
 0x1da   :  { %v731_v2 = vmax.f32 %v727_v63, 0.0 }
 0x1dc   :  { %v732_v3 = vpack.c.bf16 %v731_v2, %v730_v1 }
 0x1de   :  { %1066 = vmatmul.mubr.bf16.vlgmr.msra.gmra.mxu0 %v732_v3 }
 0x29e   :  { %v838_v43 = vpop.f32.mrf.mxu0 }
 0x29f   :  { %v839_v7 = vadd.f32 %v919_v4, %v838_v43 }
 0x2a0   :  { %v1067_v5 = vpop.f32.mrf.mxu0 }
 0x2a2   :  { %v841_v6 = vpop.f32.mrf.mxu0 }
 0x2a3   :  { %v842_v8 = vadd.f32 %v919_v4, %v841_v6 }
 0x2a4   :  { %v1068_v9 = vpop.f32.mrf.mxu0 }
 0x2a5   :  { %v935_v10 = vpack.c.bf16 %v842_v8, %v839_v7 }
 0x2a7   :  { %936 = vst [vmem:[%s1457_s7] sm:$0xff] %v935_v10  }

</bundles_post_ra>
